<compile_context>
chip_gen: v6e
topology: v6e:2x2x1
jax: 0.10.0
libtpu: 0.0.40
codegen_flags: <defaults>
</compile_context>

<pallas_src>
import functools

import jax
import jax.numpy as jnp
from jax.experimental import pallas as pl
from jax.experimental.pallas import tpu as pltpu


# ----------------------------------------------------------------------------
# Kernel 1: streaming, lane-dense partial sum of x over L.
# ----------------------------------------------------------------------------
def _stream_sum_kernel(x_ref, out_ref, *, tl, cw, L, tpc, needs_mask):
    """x_ref: (R, tl) tile of the (R=B*C, L) view.  out_ref: (R, 128) per-core
    partial sums, resident across the reduction axis (t)."""
    c = pl.program_id(0)                      # core split of the L tiles
    t = pl.program_id(1)                      # L-tile index within this core

    @pl.when(t == 0)
    def _init():
        out_ref[...] = jnp.zeros_like(out_ref)

    nrows = out_ref.shape[0]
    tile_start = (c * tpc + t) * tl           # logical (unclamped) start along L

    def tile_sum(masked):
        if masked:
            lane_iota = jax.lax.broadcasted_iota(jnp.int32, (nrows, cw), 1)

        def body(k, acc):
            off = pl.multiple_of(k * cw, cw)
            chunk = x_ref[:, pl.ds(off, cw)]
            if masked:
                gidx = lane_iota + (tile_start + off)
                chunk = jnp.where(gidx < L, chunk, jnp.zeros_like(chunk))
            for j in range(cw // 128):        # pure VPU adds, 128-lane chunks
                acc = acc + chunk[:, j * 128:(j + 1) * 128]
            return acc

        return jax.lax.fori_loop(0, tl // cw, body,
                                 jnp.zeros((nrows, 128), jnp.float32))

    if needs_mask:
        # Only the boundary / phantom tile pays for per-element masking; full
        # interior tiles stay on the clean vld+vadd loop.
        full = (tile_start + tl) <= L

        @pl.when(full)
        def _full():
            out_ref[...] += tile_sum(False)

        @pl.when(jnp.logical_not(full))
        def _edge():
            out_ref[...] += tile_sum(True)
    else:
        out_ref[...] += tile_sum(False)


# ----------------------------------------------------------------------------
# Kernel 2: tiny epilogue (attention + channel scaling + learning MLP).
# ----------------------------------------------------------------------------
def _afs_head_kernel(part_ref, w1_ref, b1_ref, w2_ref, b2_ref,
                     wa_ref, ba_ref, wb_ref, bb_ref, wc_ref, bc_ref,
                     out_ref, *, ncores, inv_l):
    # part_ref: (ncores, B, C, 128) lane-dense partial sums.
    total = part_ref[0]
    for i in range(1, ncores):
        total = total + part_ref[i]
    xm = jnp.sum(total, axis=-1) * inv_l                           # (B, C) mean_L(x)

    # AttentionModule: scores = sigmoid(W2 @ relu(W1 @ xm))
    h = jnp.maximum(
        jnp.dot(xm, w1_ref[...], preferred_element_type=jnp.float32)
        + b1_ref[...], 0.0)
    scores = jax.nn.sigmoid(
        jnp.dot(h, w2_ref[...], preferred_element_type=jnp.float32)
        + b2_ref[...])                                             # (B, 1)

    # Hoisted scaling: mean_L(x * scores) == xm * scores_per_channel.
    # PyTorch's (B,C,L)*(B,1) broadcast aligns scores with the CHANNEL axis
    # (requires B == C).  Build the (1, C) score row via a diag mask + sublane
    # reduce (exact; no transpose / extra matmul).
    n = xm.shape[0]
    row_ids = jax.lax.broadcasted_iota(jnp.int32, (n, n), 0)
    col_ids = jax.lax.broadcasted_iota(jnp.int32, (n, n), 1)
    eye = (row_ids == col_ids).astype(jnp.float32)
    scores_row = jnp.sum(eye * scores, axis=0, keepdims=True)      # (1, C)
    xm2 = xm * scores_row

    # LearningModule: 3-layer MLP; output padded to a lane-dense width.
    h1 = jnp.maximum(
        jnp.dot(xm2, wa_ref[...], preferred_element_type=jnp.float32)
        + ba_ref[...], 0.0)
    h2 = jnp.maximum(
        jnp.dot(h1, wb_ref[...], preferred_element_type=jnp.float32)
        + bb_ref[...], 0.0)
    out_ref[...] = (
        jnp.dot(h2, wc_ref[...], preferred_element_type=jnp.float32)
        + bc_ref[...])


# ----------------------------------------------------------------------------
# Host-side sizing helpers.
# ----------------------------------------------------------------------------
def _vmem_budgets():
    """Per-generation sizing: big x tiles on 128-MiB-VMEM chips (v5e/v6e),
    conservative on v7x (64 MiB physical per TensorCore)."""
    cap = 64 << 20
    try:
        info = pltpu.get_tpu_info()
        cap = int(getattr(info, "vmem_capacity_bytes", cap))
    except Exception:
        pass
    per_buffer = max(4 << 20, min(24 << 20, cap // 5))
    return cap, per_buffer


def _choose_tiling(R, L, per_buffer_bytes):
    """Largest lane-dense L tile that fits the per-buffer budget (tile is
    double-buffered by the pipeline), plus the inner chunk width."""
    r_pad = ((max(R, 1) + 7) // 8) * 8           # sublane-padded row count
    lanes_budget = max(128, per_buffer_bytes // (r_pad * 4))
    l_ceil = ((L + 127) // 128) * 128
    if l_ceil <= lanes_budget:
        tl = l_ceil                               # whole (padded) L in one tile
    elif lanes_budget >= 512:
        tl = (lanes_budget // 512) * 512          # big tile, multiple of 512
    else:
        tl = (lanes_budget // 128) * 128          # huge-R edge case (rare)
    cw = min(512, tl)                             # inner chunk: amortize loop overhead
    while tl % cw:
        cw -= 128
    return tl, cw


def afs_forward(x, params):
    B, C, L = x.shape
    if B != C:
        raise ValueError(
            "AFS inherits PyTorch's (B,C,L)*(B,1) broadcast, which requires "
            f"batch == in_channels; got B={B}, C={C}.")
    num_classes = params["wc"].shape[1]
    out_pad = ((num_classes + 127) // 128) * 128  # lane-dense output store
    wc_p = jnp.pad(params["wc"], ((0, 0), (0, out_pad - num_classes)))
    bc_p = jnp.pad(params["bc"], ((0, 0), (0, out_pad - num_classes)))

    R = B * C
    x2 = x.reshape(R, L)                          # contiguous view; fills sublane tiles

    # Degenerate tiny-L case: pad once to a full lane tile (cheap); large L is
    # handled with cdiv + in-kernel masking (no copy of x).
    L_eff = L
    if L < 128:
        x2 = jnp.pad(x2, ((0, 0), (0, 128 - L)))
        L_eff = 128

    cap, per_buffer = _vmem_budgets()
    tl, cw = _choose_tiling(R, L_eff, per_buffer)
    nt = pl.cdiv(L_eff, tl)
    ncores = 2 if nt >= 2 else 1                  # v7x: stream on both TensorCores
    tpc = pl.cdiv(nt, ncores)
    needs_mask = (L_eff % tl != 0) or (ncores * tpc != nt)

    r_pad = ((R + 7) // 8) * 8
    tile_bytes = r_pad * tl * 4
    vmem_limit = max(16 << 20, min(int(cap * 0.85), 2 * tile_bytes + (8 << 20)))

    def x_map(c, t):
        # Clamp phantom tiles (odd tile count split across cores) to a valid
        # block; their contribution is masked to zero in-kernel.
        return (0, jnp.minimum(c * tpc + t, nt - 1))

    partials = pl.pallas_call(
        functools.partial(_stream_sum_kernel, tl=tl, cw=cw, L=L_eff, tpc=tpc,
                          needs_mask=needs_mask),
        out_shape=jax.ShapeDtypeStruct((ncores, R, 128), jnp.float32),
        grid=(ncores, tpc),
        in_specs=[pl.BlockSpec((R, tl), x_map)],
        out_specs=pl.BlockSpec((None, R, 128), lambda c, t: (c, 0, 0)),
        compiler_params=pltpu.CompilerParams(
            dimension_semantics=("parallel", "arbitrary"),
            vmem_limit_bytes=vmem_limit),
    )(x2)

    # Free regrouping of a tiny (ncores, B*C, 128) array so the epilogue never
    # needs an in-kernel sublane<->lane reshape.
    part_bc = partials.reshape(ncores, B, C, 128)

    out = pl.pallas_call(
        functools.partial(_afs_head_kernel, ncores=ncores, inv_l=1.0 / float(L)),
        out_shape=jax.ShapeDtypeStruct((B, out_pad), jnp.float32),
    )(part_bc, params["w1"], params["b1"], params["w2"], params["b2"],
      params["wa"], params["ba"], params["wb"], params["bb"], wc_p, bc_p)
    return out[:, :num_classes]


# ----------------------------------------------------------------------------
# Parameter init (PyTorch-style) and pure-JAX reference.
# ----------------------------------------------------------------------------
def _linear_params(key, in_features, out_features):
    kw, kb = jax.random.split(key)
    bound = 1.0 / jnp.sqrt(jnp.float32(in_features))
    w = jax.random.uniform(kw, (in_features, out_features), jnp.float32,
                           minval=-bound, maxval=bound)
    b = jax.random.uniform(kb, (1, out_features), jnp.float32,
                           minval=-bound, maxval=bound)
    return w, b


def init_afs_params(key, in_channels, hidden_dim, num_classes):
    k1, k2, k3, k4, k5 = jax.random.split(key, 5)
    w1, b1 = _linear_params(k1, in_channels, hidden_dim)   # attention fc1
    w2, b2 = _linear_params(k2, hidden_dim, 1)              # attention fc2
    wa, ba = _linear_params(k3, in_channels, 128)            # learning fc1
    wb, bb = _linear_params(k4, 128, 64)                     # learning fc2
    wc, bc = _linear_params(k5, 64, num_classes)             # learning fc3
    return dict(w1=w1, b1=b1, w2=w2, b2=b2,
                wa=wa, ba=ba, wb=wb, bb=bb, wc=wc, bc=bc)


def afs_reference(x, p):
    """Pure-JAX reference mirroring the PyTorch forward exactly."""
    xm = jnp.mean(x, axis=2)
    h = jnp.maximum(xm @ p["w1"] + p["b1"], 0.0)
    scores = jax.nn.sigmoid(h @ p["w2"] + p["b2"])     # (B, 1)
    xw = x * scores                                    # PyTorch (B,C,L)*(B,1) broadcast
    xm2 = jnp.mean(xw, axis=2)
    h1 = jnp.maximum(xm2 @ p["wa"] + p["ba"], 0.0)
    h2 = jnp.maximum(h1 @ p["wb"] + p["bb"], 0.0)
    return h2 @ p["wc"] + p["bc"]


if __name__ == "__main__":
    # NOTE: the original PyTorch broadcast (B,C,L)*(B,1) only works if B == C.
    B = 4
    in_channels = 4          # must equal B (inherited from the original module)
    L = 16
    hidden_dim = 8
    num_classes = 5

    key = jax.random.PRNGKey(0)
    kx, kp = jax.random.split(key)
    x = jax.random.normal(kx, (B, in_channels, L), jnp.float32)
    params = init_afs_params(kp, in_channels, hidden_dim, num_classes)

    logits = jax.block_until_ready(afs_forward(x, params))
    ref = afs_reference(x, params)

    assert logits.shape == (B, num_classes)
    assert jnp.allclose(logits, ref, atol=1e-4, rtol=1e-4), "mismatch vs reference"

    print("KERNEL_OK")
</pallas_src>

<mosaic_0001>
module attributes {stable_mosaic.version = 11 : i64} {
  func.func @_stream_sum_kernel(%arg0: i32, %arg1: i32, %arg2: memref<16x128xf32, #tpu.memory_space<vmem>>, %arg3: memref<1x16x128xf32, #tpu.memory_space<vmem>>) attributes {dimension_semantics = [#tpu.dimension_semantics<parallel>, #tpu.dimension_semantics<arbitrary>], iteration_bounds = array<i64: 1, 1>, scalar_prefetch = 0 : i64, scratch_operands = 0 : i64, tpu.core_type = #tpu.core_type<tc>, window_params = [{transform_indices = @transform_0, window_bounds = array<i64: 16, 128>}, {transform_indices = @transform_1, window_bounds = array<i64: 1, 16, 128>}]} {
    %c0_i32 = arith.constant 0 : i32
    %0 = arith.cmpi eq, %arg1, %c0_i32 : i32
    %1 = arith.extui %0 : i1 to i32
    %c0_i32_0 = arith.constant 0 : i32
    %2 = arith.cmpi ne, %1, %c0_i32_0 : i32
    scf.if %2 {
      %cst_8 = arith.constant 0.000000e+00 : f32
      %15 = vector.broadcast %cst_8 : f32 to vector<16x128xf32>
      %c0_9 = arith.constant 0 : index
      %c0_10 = arith.constant 0 : index
      %c0_11 = arith.constant 0 : index
      %16 = vector.load %arg3[%c0_9, %c0_10, %c0_11] : memref<1x16x128xf32, #tpu.memory_space<vmem>>, vector<1x16x128xf32>
      %17 = vector.shape_cast %16 : vector<1x16x128xf32> to vector<16x128xf32>
      %18 = vector.shape_cast %15 : vector<16x128xf32> to vector<1x16x128xf32>
      tpu.vector_store %arg3[%c0_9, %c0_10, %c0_11], %18 {strides = array<i32>} : memref<1x16x128xf32, #tpu.memory_space<vmem>>, vector<1x16x128xf32>,
    } else {
    }
    %c0 = arith.constant 0 : index
    %c0_1 = arith.constant 0 : index
    %c0_2 = arith.constant 0 : index
    %3 = vector.load %arg3[%c0, %c0_1, %c0_2] : memref<1x16x128xf32, #tpu.memory_space<vmem>>, vector<1x16x128xf32>
    %4 = vector.shape_cast %3 : vector<1x16x128xf32> to vector<16x128xf32>
    %cst = arith.constant 0.000000e+00 : f32
    %5 = vector.broadcast %cst : f32 to vector<16x128xf32>
    %c0_i32_3 = arith.constant 0 : i32
    %c128_i32 = arith.constant 128 : i32
    %6 = arith.muli %c0_i32_3, %c128_i32 : i32
    %7 = tpu.assume_multiple %6, 128 : i32
    %c0_4 = arith.constant 0 : index
    %8 = arith.index_cast %7 : i32 to index
    %9 = vector.load %arg2[%c0_4, %8] : memref<16x128xf32, #tpu.memory_space<vmem>>, vector<16x128xf32>
    %10 = arith.addf %5, %9 : vector<16x128xf32>
    %c1_i32 = arith.constant 1 : i32
    %11 = arith.addf %4, %10 : vector<16x128xf32>
    %c0_5 = arith.constant 0 : index
    %c0_6 = arith.constant 0 : index
    %c0_7 = arith.constant 0 : index
    %12 = vector.load %arg3[%c0_5, %c0_6, %c0_7] : memref<1x16x128xf32, #tpu.memory_space<vmem>>, vector<1x16x128xf32>
    %13 = vector.shape_cast %12 : vector<1x16x128xf32> to vector<16x128xf32>
    %14 = vector.shape_cast %11 : vector<16x128xf32> to vector<1x16x128xf32>
    tpu.vector_store %arg3[%c0_5, %c0_6, %c0_7], %14 {strides = array<i32>} : memref<1x16x128xf32, #tpu.memory_space<vmem>>, vector<1x16x128xf32>,
    return
  }
  func.func @transform_0(%arg0: i32, %arg1: i32) -> (i32, i32) {
    %c1_i32 = arith.constant 1 : i32
    %0 = arith.muli %arg0, %c1_i32 : i32
    %1 = arith.addi %0, %arg1 : i32
    %c0_i32 = arith.constant 0 : i32
    %2 = arith.minsi %1, %c0_i32 : i32
    %c0_i32_0 = arith.constant 0 : i32
    %c0_i32_1 = arith.constant 0 : i32
    return %c0_i32_0, %2 : i32, i32
  }
  func.func @transform_1(%arg0: i32, %arg1: i32) -> (i32, i32, i32) {
    %c0_i32 = arith.constant 0 : i32
    %c0_i32_0 = arith.constant 0 : i32
    %c0_i32_1 = arith.constant 0 : i32
    return %arg0, %c0_i32, %c0_i32_0 : i32, i32, i32
  }
}

</mosaic_0001>

<bundles_post_ra>
// kernel: tpu_custom_call.1
= control target key start
LH: loop header
LB: loop body
LE: loop exit
PB: predicated region body
PF: predicated region fallthrough
CT: control target
= control target key end

     0   :  { %6 = vsyncpa [#allocation3], 0  ;;  %s135_s0 = inlined_call_operand.hbm [shape: f32[16,128], index: 0, kind: input, shape index: {}]   ;;  %s136_s1 = inlined_call_operand.hbm [shape: f32[1,16,128], index: 1, kind: output, shape index: {}]  }
   0x1   :  { %7 = vsyncpa [#allocation4], 0  ;;  %s115_s6 = smov [#allocation2]  }
   0x2   :  { %s18_s7 = sshll.u32 %s115_s6, 4  ;;  %s19_s7 = int_to_ptr.vmem [resolvable:$true] %s18_s7 }
   0x3   :  { %s79_s8 = scalar_lea.vmem %s19_s7, 256  ;;  %p84_p1 = scmp.lt.s32.totalorder %s19_s7, %s19_s7 }
   0x4   :  { %p80_p0 = scmp.ne.s32.totalorder %s19_s7, %s79_s8  ;;  %p85_p2 = scmp.lt.s32.totalorder %s79_s8, %s79_s8 }
   0x6   :  { %p86_p3 = por %p85_p2, %p84_p1 }
   0x8   :  { %p87_p4 = pnand %p86_p3, %p80_p0 }
   0xa   :  { %90 = shalt.err (!%p87_p4)
}
   0xb   :  { %s116_s9 = smov 128   ;;  %s117_s10 = smov 8  }
   0xc   :  { %24 = dma.hbm_to_vmem [thread:$0]  %s135_s0, 256, %s19_s7, [#allocation3], %s116_s9, %s116_s9, %s117_s10  }
   0xd   :  { %111 = dma.done.wait [#allocation3], 256  }
   0xe   :  { %112 = vsyncadd [#allocation3], 4294967040  ;;  %s118_s13 = smov [#allocation5]   ;;  %v39_v0 = vld [vmem:[#allocation2] sm:$0xff]  ;;  %v40_v1 = vld [vmem:[#allocation2 + $0x8] sm:$0xff] }
   0xf   :  { %s52_s14 = sshll.u32 %s118_s13, 4  ;;  %45 = vst [vmem:[#allocation5] sm:$0xff] %v39_v0  ;;  %46 = vst [vmem:[#allocation5 + $0x8] sm:$0xff] %v40_v1  ;;  %s53_s14 = int_to_ptr.vmem [resolvable:$true] %s52_s14 }
  0x10   :  { %s91_s15 = scalar_lea.vmem %s53_s14, 256  ;;  %p96_p6 = scmp.lt.s32.totalorder %s53_s14, %s53_s14 }
  0x11   :  { %p92_p5 = scmp.ne.s32.totalorder %s53_s14, %s91_s15  ;;  %p97_p7 = scmp.lt.s32.totalorder %s91_s15, %s91_s15 }
  0x13   :  { %p98_p8 = por %p97_p7, %p96_p6 }
  0x15   :  { %p99_p9 = pnand %p98_p8, %p92_p5 }
  0x17   :  { %102 = shalt.err (!%p99_p9)
}
  0x18   :  { %58 = dma.vmem_to_hbm [thread:$0]  %s53_s14, 256, %s136_s1, [#allocation4], %s116_s9, %s116_s9, %s117_s10  }
  0x19   :  { %113 = dma.done.wait [#allocation4], 256  }
  0x1a   :  { %114 = vsyncadd [#allocation4], 4294967040 }
  0x1b   :  { %62 = vsyncpa [#allocation3], 1 }
  0x1c   :  { %63 = vsyncpa [#allocation4], 1 }

</bundles_post_ra>
